<compile_context>
chip_gen: v7x
topology: tpu7x:2x2x1
jax: 0.10.0
libtpu: 0.0.40
codegen_flags: <defaults>
</compile_context>

<pallas_src>
import jax
import jax.numpy as jnp
from jax.experimental import pallas as pl
from jax.experimental.pallas import tpu as pltpu


def nccf_kernel(x_ref, w1_ref, b1_ref, w2_ref, b2_ref, o_ref):
    # lin1 on the MXU: bf16 operands, f32 accumulation.
    h = jnp.dot(x_ref[...], w1_ref[...], preferred_element_type=jnp.float32)
    # bias + ReLU in f32 on the VPU (dropout == identity in eval mode).
    h = jnp.maximum(h + b1_ref[...], 0.0)
    # lin2 (64 -> 1): VPU multiply + lane reduce instead of an N=1 MXU matmul.
    out = jnp.sum(h * w2_ref[...], axis=-1, keepdims=True) + b2_ref[...]
    o_ref[...] = out.astype(o_ref.dtype)


def nccf_forward(users, items, feats, params, *, tb=512):
    """users, items: int32 [B]; feats: f32 [B, F]. Returns f32 [B, 1]."""
    emb_u = jnp.take(params["emb_user"], users, axis=0)   # [B, L] (glue: gather)
    emb_i = jnp.take(params["emb_item"], items, axis=0)   # [B, L]
    # Single lane-dense input slab, cast to bf16 for the MXU matmul.
    x = jnp.concatenate([emb_u, emb_i, feats], axis=1).astype(jnp.bfloat16)

    B, d_in = x.shape
    H = params["w1"].shape[1]   # 64

    nb = pl.cdiv(B, tb)
    b_pad = nb * tb
    if b_pad != B:
        x = jnp.pad(x, ((0, b_pad - B), (0, 0)))

    w1 = params["w1"].astype(jnp.bfloat16)                 # [d_in, H]
    b1 = params["b1"].reshape(1, H).astype(jnp.float32)    # [1, H]
    w2 = params["w2"].reshape(1, H).astype(jnp.float32)    # [1, H] row for VPU reduce
    b2 = params["b2"].reshape(1, 1).astype(jnp.float32)    # [1, 1]

    out = pl.pallas_call(
        nccf_kernel,
        out_shape=jax.ShapeDtypeStruct((b_pad, 1), jnp.float32),
        grid_spec=pltpu.PrefetchScalarGridSpec(
            num_scalar_prefetch=0,
            grid=(nb,),
            in_specs=[
                pl.BlockSpec((tb, d_in), lambda i: (i, 0)),   # x tile (pipelined)
                pl.BlockSpec((d_in, H), lambda i: (0, 0)),    # W1 (resident)
                pl.BlockSpec((1, H), lambda i: (0, 0)),       # b1 (resident)
                pl.BlockSpec((1, H), lambda i: (0, 0)),       # w2 row (resident)
                pl.BlockSpec((1, 1), lambda i: (0, 0)),       # b2 (resident)
            ],
            out_specs=pl.BlockSpec((tb, 1), lambda i: (i, 0)),
        ),
        compiler_params=pltpu.CompilerParams(
            dimension_semantics=("parallel",),
        ),
    )(x, w1, b1, w2, b2)
    return out[:B]


def init_params(key, n_users, n_items, latent_size, feats_size, hidden=64):
    """Deterministic synthetic params matching the PyTorch module's shapes."""
    d_in = 2 * latent_size + feats_size
    k = jax.random.split(key, 6)
    return {
        "emb_user": jax.random.normal(k[0], (n_users, latent_size), jnp.float32),
        "emb_item": jax.random.normal(k[1], (n_items, latent_size), jnp.float32),
        # PyTorch Linear stores weight as [out, in]; we keep [in, out] for x @ W.
        "w1": jax.random.normal(k[2], (d_in, hidden), jnp.float32) * 0.05,
        "b1": jax.random.normal(k[3], (1, hidden), jnp.float32) * 0.05,
        "w2": jax.random.normal(k[4], (hidden, 1), jnp.float32) * 0.05,
        "b2": jax.random.normal(k[5], (1, 1), jnp.float32) * 0.05,
    }


if __name__ == "__main__":
    n_users, n_items = 32, 48
    latent_size, feats_size = 16, 32
    B = 8

    key = jax.random.PRNGKey(0)
    kp, ku, ki, kf = jax.random.split(key, 4)

    params = init_params(kp, n_users, n_items, latent_size, feats_size)
    users = jax.random.randint(ku, (B,), 0, n_users, dtype=jnp.int32)
    items = jax.random.randint(ki, (B,), 0, n_items, dtype=jnp.int32)
    feats = jax.random.normal(kf, (B, feats_size), jnp.float32)

    out = nccf_forward(users, items, feats, params)
    out = jax.block_until_ready(out)
    assert out.shape == (B, 1)

    # Pure-JAX reference with the same bf16 matmul operands (f32 accumulation),
    # matching what the kernel computes on the MXU.
    eu = jnp.take(params["emb_user"], users, axis=0)
    ei = jnp.take(params["emb_item"], items, axis=0)
    x_ref = jnp.concatenate([eu, ei, feats], axis=1).astype(jnp.bfloat16).astype(jnp.float32)
    w1_ref = params["w1"].astype(jnp.bfloat16).astype(jnp.float32)
    h_ref = jnp.maximum(x_ref @ w1_ref + params["b1"], 0.0)
    ref = h_ref @ params["w2"] + params["b2"]
    assert jnp.allclose(out, ref, atol=1e-2, rtol=1e-2), (
        f"max abs err {jnp.max(jnp.abs(out - ref))}"
    )

    print("KERNEL_OK")
</pallas_src>

<mosaic_0001>
module attributes {stable_mosaic.version = 11 : i64} {
  func.func @nccf_kernel(%arg0: i32, %arg1: memref<512x64xbf16, #tpu.memory_space<vmem>>, %arg2: memref<64x64xbf16, #tpu.memory_space<vmem>>, %arg3: memref<1x64xf32, #tpu.memory_space<vmem>>, %arg4: memref<1x64xf32, #tpu.memory_space<vmem>>, %arg5: memref<1x1xf32, #tpu.memory_space<vmem>>, %arg6: memref<512x1xf32, #tpu.memory_space<vmem>>) attributes {dimension_semantics = [#tpu.dimension_semantics<parallel>], iteration_bounds = array<i64: 1>, scalar_prefetch = 0 : i64, scratch_operands = 0 : i64, tpu.core_type = #tpu.core_type<tc>, window_params = [{transform_indices = @transform_0, window_bounds = array<i64: 512, 64>}, {pipeline_mode = #tpu.pipeline_mode<synchronous>, transform_indices = @transform_1, window_bounds = array<i64: 64, 64>}, {pipeline_mode = #tpu.pipeline_mode<synchronous>, transform_indices = @transform_2, window_bounds = array<i64: 1, 64>}, {pipeline_mode = #tpu.pipeline_mode<synchronous>, transform_indices = @transform_3, window_bounds = array<i64: 1, 64>}, {pipeline_mode = #tpu.pipeline_mode<synchronous>, transform_indices = @transform_4, window_bounds = array<i64: 1, 1>}, {transform_indices = @transform_5, window_bounds = array<i64: 512, 1>}]} {
    %c0 = arith.constant 0 : index
    %c0_0 = arith.constant 0 : index
    %0 = vector.load %arg1[%c0, %c0_0] : memref<512x64xbf16, #tpu.memory_space<vmem>>, vector<512x64xbf16>
    %c0_1 = arith.constant 0 : index
    %c0_2 = arith.constant 0 : index
    %1 = vector.load %arg2[%c0_1, %c0_2] : memref<64x64xbf16, #tpu.memory_space<vmem>>, vector<64x64xbf16>
    %cst = arith.constant dense<0.000000e+00> : vector<512x64xf32>
    %2 = tpu.matmul %0, %1, %cst {dimension_numbers = #tpu.dot_dimension_numbers<[1], [0], [0], [1], [0, 0, 1, 1], [], []>} : vector<512x64xbf16>, vector<64x64xbf16>, vector<512x64xf32> -> vector<512x64xf32>
    %c0_3 = arith.constant 0 : index
    %c0_4 = arith.constant 0 : index
    %3 = vector.load %arg3[%c0_3, %c0_4] : memref<1x64xf32, #tpu.memory_space<vmem>>, vector<1x64xf32>
    %4 = vector.broadcast %3 : vector<1x64xf32> to vector<512x64xf32>
    %5 = arith.addf %2, %4 : vector<512x64xf32>
    %cst_5 = arith.constant 0.000000e+00 : f32
    %6 = vector.broadcast %cst_5 : f32 to vector<512x64xf32>
    %7 = arith.maximumf %5, %6 : vector<512x64xf32>
    %c0_6 = arith.constant 0 : index
    %c0_7 = arith.constant 0 : index
    %8 = vector.load %arg4[%c0_6, %c0_7] : memref<1x64xf32, #tpu.memory_space<vmem>>, vector<1x64xf32>
    %9 = vector.broadcast %8 : vector<1x64xf32> to vector<512x64xf32>
    %10 = arith.mulf %7, %9 : vector<512x64xf32>
    %cst_8 = arith.constant dense<0.000000e+00> : vector<512xf32>
    %11 = vector.multi_reduction <add>, %10, %cst_8 [1] : vector<512x64xf32> to vector<512xf32>
    %12 = vector.shape_cast %11 : vector<512xf32> to vector<512x1xf32>
    %c0_9 = arith.constant 0 : index
    %c0_10 = arith.constant 0 : index
    %13 = vector.load %arg5[%c0_9, %c0_10] : memref<1x1xf32, #tpu.memory_space<vmem>>, vector<1x1xf32>
    %14 = vector.broadcast %13 : vector<1x1xf32> to vector<512x1xf32>
    %15 = arith.addf %12, %14 : vector<512x1xf32>
    %c0_11 = arith.constant 0 : index
    %c0_12 = arith.constant 0 : index
    %16 = vector.load %arg6[%c0_11, %c0_12] : memref<512x1xf32, #tpu.memory_space<vmem>>, vector<512x1xf32>
    tpu.vector_store %arg6[%c0_11, %c0_12], %15 {strides = array<i32>} : memref<512x1xf32, #tpu.memory_space<vmem>>, vector<512x1xf32>,
    return
  }
  func.func @transform_0(%arg0: i32) -> (i32, i32) {
    %c0_i32 = arith.constant 0 : i32
    %c0_i32_0 = arith.constant 0 : i32
    return %arg0, %c0_i32 : i32, i32
  }
  func.func @transform_1(%arg0: i32) -> (i32, i32) {
    %c0_i32 = arith.constant 0 : i32
    %c0_i32_0 = arith.constant 0 : i32
    %c0_i32_1 = arith.constant 0 : i32
    return %c0_i32, %c0_i32_0 : i32, i32
  }
  func.func @transform_2(%arg0: i32) -> (i32, i32) {
    %c0_i32 = arith.constant 0 : i32
    %c0_i32_0 = arith.constant 0 : i32
    %c0_i32_1 = arith.constant 0 : i32
    return %c0_i32, %c0_i32_0 : i32, i32
  }
  func.func @transform_3(%arg0: i32) -> (i32, i32) {
    %c0_i32 = arith.constant 0 : i32
    %c0_i32_0 = arith.constant 0 : i32
    %c0_i32_1 = arith.constant 0 : i32
    return %c0_i32, %c0_i32_0 : i32, i32
  }
  func.func @transform_4(%arg0: i32) -> (i32, i32) {
    %c0_i32 = arith.constant 0 : i32
    %c0_i32_0 = arith.constant 0 : i32
    %c0_i32_1 = arith.constant 0 : i32
    return %c0_i32, %c0_i32_0 : i32, i32
  }
  func.func @transform_5(%arg0: i32) -> (i32, i32) {
    %c0_i32 = arith.constant 0 : i32
    %c0_i32_0 = arith.constant 0 : i32
    return %arg0, %c0_i32 : i32, i32
  }
}

</mosaic_0001>

<bundles_post_ra>
// kernel: tpu_custom_call.1
= control target key start
LH: loop header
LB: loop body
LE: loop exit
PB: predicated region body
PF: predicated region fallthrough
CT: control target
= control target key end

     0   :  { %vm286_vm0 = vcmask 523264   ;;  %vm1070_vm1 = vcmask 7168   ;;  %s2194_s1 = inlined_call_operand.vmem [shape: bf16[64,64], index: 1, kind: input, shape index: {}]   ;;  %s2195_s0 = inlined_call_operand.vmem [shape: bf16[512,64], index: 0, kind: input, shape index: {}]   ;;  %s2196_s2 = inlined_call_operand.vmem [shape: f32[1,64], index: 2, kind: input, shape index: {}]   ;;  %s2197_s3 = inlined_call_operand.vmem [shape: f32[1,64], index: 3, kind: input, shape index: {}]   ;;  %s2198_s4 = inlined_call_operand.<no memory space> [shape: f32[1,1], index: 4, kind: input, shape index: {}]   ;;  %s2199_s5 = inlined_call_operand.vmem [shape: f32[512,1], index: 5, kind: output, shape index: {}]  }
   0x1   :  { %v1326_v0 = vld [vmem:[%s2194_s1] sm:$0xff]   ;;  %v1327_v1 = vld [vmem:[%s2194_s1 + $0x8] sm:$0xff]   ;;  %v1328_v2 = vld [vmem:[%s2194_s1 + $0x10] sm:$0xff]  }
   0x2   :  { %1246 = vmatprep.subr.bf16.mxu0 %v1326_v0  ;;  %1318 = vmatprep.subr.bf16.mxu1 %v1326_v0  ;;  %v1330_v3 = vld [vmem:[%s2195_s0] sm:$0xff]   ;;  %v1329_v5 = vld [vmem:[%s2194_s1 + $0x18] sm:$0xff]   ;;  %v1332_v6 = vld [vmem:[%s2195_s0 + $0x8] sm:$0xff]  }
   0x3   :  { %1247 = vmatpush3.bf16.msra.mxu0 %v1326_v0  ;;  %1322 = vmatpush3.bf16.msra.mxu1 %v1326_v0  ;;  %v1331_v4 = vld [vmem:[%s2195_s0 + $0x80] sm:$0xff]   ;;  %v1333_v7 = vld [vmem:[%s2195_s0 + $0x88] sm:$0xff]   ;;  %v1334_v8 = vld [vmem:[%s2195_s0 + $0x10] sm:$0xff]  }
   0x4   :  { %1248 = vmatprep.subr.bf16.mxu0 %v1327_v1  ;;  %1319 = vmatprep.subr.bf16.mxu1 %v1327_v1  ;;  %v1336_v9 = vld [vmem:[%s2195_s0 + $0x90] sm:$0xff]   ;;  %v1335_v10 = vld [vmem:[%s2195_s0 + $0x18] sm:$0xff]   ;;  %v1338_v12 = vld [vmem:[%s2195_s0 + $0x20] sm:$0xff]  }
   0x5   :  { %1254 = vmatprep.mubr.msk.bf16.mxu0 %vm286_vm0, %v1330_v3  ;;  %1286 = vmatprep.mubr.msk.bf16.mxu1 %vm286_vm0, %v1331_v4  ;;  %v1337_v11 = vld [vmem:[%s2195_s0 + $0x98] sm:$0xff]   ;;  %v1340_v13 = vld [vmem:[%s2195_s0 + $0xa0] sm:$0xff]   ;;  %v1339_v14 = vld [vmem:[%s2195_s0 + $0x28] sm:$0xff]  }
   0x6   :  { %v1341_v15 = vld [vmem:[%s2195_s0 + $0xa8] sm:$0xff]   ;;  %v1342_v16 = vld [vmem:[%s2195_s0 + $0x30] sm:$0xff]   ;;  %v1343_v18 = vld [vmem:[%s2195_s0 + $0x38] sm:$0xff]  }
   0x7   :  { %1249 = vmatpush3.bf16.msra.mxu0 %v1327_v1  ;;  %1323 = vmatpush3.bf16.msra.mxu1 %v1327_v1  ;;  %v1344_v17 = vld [vmem:[%s2195_s0 + $0xb0] sm:$0xff]   ;;  %v1345_v19 = vld [vmem:[%s2195_s0 + $0xb8] sm:$0xff]   ;;  %v1346_v20 = vld [vmem:[%s2195_s0 + $0x40] sm:$0xff]  }
   0x8   :  { %1250 = vmatprep.subr.bf16.mxu0 %v1328_v2  ;;  %1320 = vmatprep.subr.bf16.mxu1 %v1328_v2  ;;  %v1348_v21 = vld [vmem:[%s2195_s0 + $0xc0] sm:$0xff]   ;;  %v1347_v22 = vld [vmem:[%s2195_s0 + $0x48] sm:$0xff]   ;;  %v1350_v24 = vld [vmem:[%s2195_s0 + $0x50] sm:$0xff]  }
   0x9   :  { %v1349_v23 = vld [vmem:[%s2195_s0 + $0xc8] sm:$0xff]   ;;  %v1352_v25 = vld [vmem:[%s2195_s0 + $0xd0] sm:$0xff]   ;;  %v1351_v26 = vld [vmem:[%s2195_s0 + $0x58] sm:$0xff]  }
   0xa   :  { %v1353_v27 = vld [vmem:[%s2195_s0 + $0xd8] sm:$0xff]   ;;  %v1354_v28 = vld [vmem:[%s2195_s0 + $0x60] sm:$0xff]   ;;  %v1355_v30 = vld [vmem:[%s2195_s0 + $0x68] sm:$0xff]  }
   0xb   :  { %1251 = vmatpush3.bf16.msra.mxu0 %v1328_v2  ;;  %1324 = vmatpush3.bf16.msra.mxu1 %v1328_v2  ;;  %v1356_v29 = vld [vmem:[%s2195_s0 + $0xe0] sm:$0xff]   ;;  %v1357_v31 = vld [vmem:[%s2195_s0 + $0xe8] sm:$0xff]   ;;  %v1358_v32 = vld [vmem:[%s2195_s0 + $0x70] sm:$0xff]  }
   0xc   :  { %1252 = vmatprep.subr.bf16.mxu0 %v1329_v5  ;;  %1321 = vmatprep.subr.bf16.mxu1 %v1329_v5  ;;  %v1360_v33 = vld [vmem:[%s2195_s0 + $0xf0] sm:$0xff]   ;;  %v1359_v34 = vld [vmem:[%s2195_s0 + $0x78] sm:$0xff]   ;;  %v1535_v36 = vld [vmem:[%s2196_s2] ss:$0 sm:$0xff] }
   0xd   :  { %v1361_v35 = vld [vmem:[%s2195_s0 + $0xf8] sm:$0xff]   ;;  %v1544_v47 = vld [vmem:[%s2197_s3] ss:$0 sm:$0xff] }
   0xf   :  { %1253 = vmatpush3.bf16.msra.mxu0 %v1329_v5  ;;  %1325 = vmatpush3.bf16.msra.mxu1 %v1329_v5 }
  0x12   :  { %1255 = vmatmul.mubr.msk.bf16.vlgmr.msra.gmra.mrb[0].mxu0 %vm286_vm0, %v1332_v6  ;;  %1287 = vmatmul.mubr.msk.bf16.vlgmr.msra.gmra.mrb[0].mxu1 %vm286_vm0, %v1333_v7 }
  0x13   :  { %1258 = vmatprep.mubr.msk.bf16.mxu0 %vm286_vm0, %v1334_v8  ;;  %1290 = vmatprep.mubr.msk.bf16.mxu1 %vm286_vm0, %v1336_v9 }
  0x1a   :  { %1259 = vmatmul.mubr.msk.bf16.gmra.mrb[4].mxu0 %vm286_vm0, %v1335_v10  ;;  %1291 = vmatmul.mubr.msk.bf16.gmra.mrb[4].mxu1 %vm286_vm0, %v1337_v11 }
  0x1b   :  { %1262 = vmatprep.mubr.msk.bf16.mxu0 %vm286_vm0, %v1338_v12  ;;  %1294 = vmatprep.mubr.msk.bf16.mxu1 %vm286_vm0, %v1340_v13 }
  0x22   :  { %1263 = vmatmul.mubr.msk.bf16.gmra.mrb[8].mxu0 %vm286_vm0, %v1339_v14  ;;  %1295 = vmatmul.mubr.msk.bf16.gmra.mrb[8].mxu1 %vm286_vm0, %v1341_v15 }
  0x23   :  { %1266 = vmatprep.mubr.msk.bf16.mxu0 %vm286_vm0, %v1342_v16  ;;  %1298 = vmatprep.mubr.msk.bf16.mxu1 %vm286_vm0, %v1344_v17 }
  0x2a   :  { %1267 = vmatmul.mubr.msk.bf16.gmra.mrb[12].mxu0 %vm286_vm0, %v1343_v18  ;;  %1299 = vmatmul.mubr.msk.bf16.gmra.mrb[12].mxu1 %vm286_vm0, %v1345_v19 }
  0x2b   :  { %1270 = vmatprep.mubr.msk.bf16.mxu0 %vm286_vm0, %v1346_v20  ;;  %1302 = vmatprep.mubr.msk.bf16.mxu1 %vm286_vm0, %v1348_v21 }
  0x32   :  { %1271 = vmatmul.mubr.msk.bf16.gmra.mrb[16].mxu0 %vm286_vm0, %v1347_v22  ;;  %1303 = vmatmul.mubr.msk.bf16.gmra.mrb[16].mxu1 %vm286_vm0, %v1349_v23 }
  0x33   :  { %1274 = vmatprep.mubr.msk.bf16.mxu0 %vm286_vm0, %v1350_v24  ;;  %1306 = vmatprep.mubr.msk.bf16.mxu1 %vm286_vm0, %v1352_v25 }
  0x3a   :  { %1275 = vmatmul.mubr.msk.bf16.gmra.mrb[20].mxu0 %vm286_vm0, %v1351_v26  ;;  %1307 = vmatmul.mubr.msk.bf16.gmra.mrb[20].mxu1 %vm286_vm0, %v1353_v27 }
  0x3b   :  { %1278 = vmatprep.mubr.msk.bf16.mxu0 %vm286_vm0, %v1354_v28  ;;  %1310 = vmatprep.mubr.msk.bf16.mxu1 %vm286_vm0, %v1356_v29 }
  0x42   :  { %1279 = vmatmul.mubr.msk.bf16.gmra.mrb[24].mxu0 %vm286_vm0, %v1355_v30  ;;  %1311 = vmatmul.mubr.msk.bf16.gmra.mrb[24].mxu1 %vm286_vm0, %v1357_v31 }
  0x43   :  { %1282 = vmatprep.mubr.msk.bf16.mxu0 %vm286_vm0, %v1358_v32  ;;  %1314 = vmatprep.mubr.msk.bf16.mxu1 %vm286_vm0, %v1360_v33 }
  0x4a   :  { %1283 = vmatmul.mubr.msk.bf16.gmra.mrb[28].mxu0 %vm286_vm0, %v1359_v34  ;;  %1315 = vmatmul.mubr.msk.bf16.gmra.mrb[28].mxu1 %vm286_vm0, %v1361_v35 }
  0xe5   :  { %v1256_v37 = vpop.f32.mrb[0].mxu0  ;;  %v1288_v38 = vpop.f32.mrb[0].mxu1 }
  0xe6   :  { %v426_v39 = vadd.f32 %v1256_v37, %v1535_v36  ;;  %v554_v40 = vadd.f32 %v1288_v38, %v1535_v36  ;;  %v417_v41 = vpop.f32.mrb[1].mxu0  ;;  %v545_v42 = vpop.f32.mrb[1].mxu1 }
  0xe7   :  { %v418_v43 = vadd.f32 %v1535_v36, %v417_v41  ;;  %v546_v44 = vadd.f32 %v1535_v36, %v545_v42  ;;  %v1257_v45 = vpop.f32.mrb[2].mxu0  ;;  %v1289_v46 = vpop.f32.mrb[2].mxu1 }
  0xe8   :  { %v674_v48 = vmax.f32 %v426_v39, 0.0  ;;  %v706_v49 = vmax.f32 %v554_v40, 0.0  ;;  %v429_v50 = vadd.f32 %v1257_v45, %v1535_v36  ;;  %v557_v51 = vadd.f32 %v1289_v46, %v1535_v36  ;;  %v420_v52 = vpop.f32.mrb[3].mxu0  ;;  %v548_v53 = vpop.f32.mrb[3].mxu1 }
  0xe9   :  { %v672_v54 = vmax.f32 %v418_v43, 0.0  ;;  %v704_v58 = vmax.f32 %v546_v44, 0.0  ;;  %v421_v60 = vadd.f32 %v1535_v36, %v420_v52  ;;  %v549_v61 = vadd.f32 %v1535_v36, %v548_v53 }
  0xea   :  { %v675_v55 = vmax.f32 %v429_v50, 0.0  ;;  %v777_v56 = vmul.f32 %v1544_v47, %v706_v49  ;;  %v745_v57 = vmul.f32 %v1544_v47, %v674_v48  ;;  %v707_v59 = vmax.f32 %v557_v51, 0.0 }
  0xeb   :  { %v743_v1 = vmul.f32 %v1544_v47, %v672_v54  ;;  %v673_v7 = vmax.f32 %v421_v60, 0.0  ;;  %v705_v8 = vmax.f32 %v549_v61, 0.0  ;;  %v775_v10 = vmul.f32 %v1544_v47, %v704_v58 }
  0xec   :  { %v909_v62 = vsel %vm286_vm0, %v777_v56, 0.0  ;;  %v813_v63 = vsel %vm286_vm0, %v745_v57, 0.0  ;;  %v746_v0 = vmul.f32 %v1544_v47, %v675_v55  ;;  %v778_v16 = vmul.f32 %v1544_v47, %v707_v59 }
  0xed   :  { %910 = vadd.xlane.f32.xlu0 %v909_v62  ;;  %814 = vadd.xlane.f32.xlu1 %v813_v63  ;;  %v1260_v2 = vpop.f32.mrb[4].mxu0  ;;  %v1292_v3 = vpop.f32.mrb[4].mxu1  ;;  %v807_v13 = vsel %vm286_vm0, %v743_v1, 0.0  ;;  %v903_v23 = vsel %vm286_vm0, %v775_v10, 0.0  ;;  %v776_v24 = vmul.f32 %v1544_v47, %v705_v8  ;;  %v744_v25 = vmul.f32 %v1544_v47, %v673_v7 }
  0xee   :  { %v442_v4 = vadd.f32 %v1260_v2, %v1535_v36  ;;  %v433_v5 = vpop.f32.mrb[5].mxu0  ;;  %v561_v6 = vpop.f32.mrb[5].mxu1  ;;  %v816_v12 = vsel %vm286_vm0, %v746_v0, 0.0  ;;  %v570_v19 = vadd.f32 %v1292_v3, %v1535_v36  ;;  %v912_v22 = vsel %vm286_vm0, %v778_v16, 0.0 }
  0xef   :  { %v1261_v9 = vpop.f32.mrb[6].mxu0  ;;  %v1293_v11 = vpop.f32.mrb[6].mxu1  ;;  %v434_v26 = vadd.f32 %v1535_v36, %v433_v5  ;;  %v562_v27 = vadd.f32 %v1535_v36, %v561_v6  ;;  %v906_v43 = vsel %vm286_vm0, %v776_v24, 0.0  ;;  %v810_v44 = vsel %vm286_vm0, %v744_v25, 0.0 }
  0xf0   :  { %v445_v14 = vadd.f32 %v1261_v9, %v1535_v36  ;;  %v436_v15 = vpop.f32.mrb[7].mxu0  ;;  %v564_v17 = vpop.f32.mrb[7].mxu1  ;;  %v678_v18 = vmax.f32 %v442_v4, 0.0  ;;  %v573_v21 = vadd.f32 %v1293_v11, %v1535_v36  ;;  %v710_v31 = vmax.f32 %v570_v19, 0.0 }
  0xf1   :  { %817 = vadd.xlane.f32.xlu1 %v816_v12  ;;  %808 = vadd.xlane.f32.xlu0 %v807_v13  ;;  %v437_v30 = vadd.f32 %v1535_v36, %v436_v15  ;;  %v565_v32 = vadd.f32 %v1535_v36, %v564_v17  ;;  %v676_v50 = vmax.f32 %v434_v26, 0.0  ;;  %v708_v51 = vmax.f32 %v562_v27, 0.0 }
  0xf2   :  { %v679_v20 = vmax.f32 %v445_v14, 0.0  ;;  %v749_v33 = vmul.f32 %v1544_v47, %v678_v18  ;;  %v711_v37 = vmax.f32 %v573_v21, 0.0  ;;  %v781_v57 = vmul.f32 %v1544_v47, %v710_v31 }
  0xf3   :  { %v677_v54 = vmax.f32 %v437_v30, 0.0  ;;  %v709_v55 = vmax.f32 %v565_v32, 0.0  ;;  %v747_v8 = vmul.f32 %v1544_v47, %v676_v50  ;;  %v779_v9 = vmul.f32 %v1544_v47, %v708_v51 }
  0xf4   :  { %v750_v38 = vmul.f32 %v1544_v47, %v679_v20  ;;  %v825_v56 = vsel %vm286_vm0, %v749_v33, 0.0  ;;  %v782_v60 = vmul.f32 %v1544_v47, %v711_v37  ;;  %v921_v6 = vsel %vm286_vm0, %v781_v57, 0.0 }
  0xf5   :  { %913 = vadd.xlane.f32.xlu1 %v912_v22  ;;  %904 = vadd.xlane.f32.xlu0 %v903_v23  ;;  %v1264_v28 = vpop.f32.mrb[8].mxu0  ;;  %v1296_v29 = vpop.f32.mrb[8].mxu1  ;;  %v748_v7 = vmul.f32 %v1544_v47, %v677_v54  ;;  %v780_v13 = vmul.f32 %v1544_v47, %v709_v55  ;;  %v819_v26 = vsel %vm286_vm0, %v747_v8, 0.0  ;;  %v915_v27 = vsel %vm286_vm0, %v779_v9, 0.0 }
  0xf6   :  { %v449_v34 = vpop.f32.mrb[9].mxu0  ;;  %v577_v35 = vpop.f32.mrb[9].mxu1  ;;  %v458_v39 = vadd.f32 %v1264_v28, %v1535_v36  ;;  %v586_v41 = vadd.f32 %v1296_v29, %v1535_v36  ;;  %v828_v58 = vsel %vm286_vm0, %v750_v38, 0.0  ;;  %v924_v12 = vsel %vm286_vm0, %v782_v60, 0.0 }
  0xf7   :  { %v1265_v40 = vpop.f32.mrb[10].mxu0  ;;  %v1297_v42 = vpop.f32.mrb[10].mxu1  ;;  %v450_v45 = vadd.f32 %v1535_v36, %v449_v34  ;;  %v578_v48 = vadd.f32 %v1535_v36, %v577_v35  ;;  %v822_v28 = vsel %vm286_vm0, %v748_v7, 0.0  ;;  %v918_v29 = vsel %vm286_vm0, %v780_v13, 0.0 }
  0xf8   :  { %v452_v46 = vpop.f32.mrb[11].mxu0  ;;  %v580_v49 = vpop.f32.mrb[11].mxu1  ;;  %v461_v52 = vadd.f32 %v1265_v40, %v1535_v36  ;;  %v589_v53 = vadd.f32 %v1297_v42, %v1535_v36  ;;  %v682_v59 = vmax.f32 %v458_v39, 0.0  ;;  %v714_v61 = vmax.f32 %v586_v41, 0.0 }
  0xf9   :  { %907 = vadd.xlane.f32.xlu1 %v906_v43  ;;  %811 = vadd.xlane.f32.xlu0 %v810_v44  ;;  %v680_v62 = vmax.f32 %v450_v45, 0.0  ;;  %v453_v63 = vadd.f32 %v1535_v36, %v452_v46  ;;  %v712_v0 = vmax.f32 %v578_v48, 0.0  ;;  %v581_v1 = vadd.f32 %v1535_v36, %v580_v49 }
  0xfa   :  { %v683_v2 = vmax.f32 %v461_v52, 0.0  ;;  %v715_v3 = vmax.f32 %v589_v53, 0.0  ;;  %v753_v14 = vmul.f32 %v1544_v47, %v682_v59  ;;  %v785_v15 = vmul.f32 %v1544_v47, %v714_v61 }
  0xfb   :  { %v681_v18 = vmax.f32 %v453_v63, 0.0  ;;  %v713_v19 = vmax.f32 %v581_v1, 0.0  ;;  %v751_v21 = vmul.f32 %v1544_v47, %v680_v62  ;;  %v783_v23 = vmul.f32 %v1544_v47, %v712_v0 }
  0xfc   :  { %v754_v24 = vmul.f32 %v1544_v47, %v683_v2  ;;  %v786_v25 = vmul.f32 %v1544_v47, %v715_v3  ;;  %v837_v30 = vsel %vm286_vm0, %v753_v14, 0.0  ;;  %v1610_v31 = vsel %vm286_vm0, %v785_v15, 0.0 }
  0xfd   :  { %829 = vadd.xlane.f32.xlu1 %v828_v58  ;;  %826 = vadd.xlane.f32.xlu0 %v825_v56  ;;  %v1268_v4 = vpop.f32.mrb[12].mxu0  ;;  %v1300_v5 = vpop.f32.mrb[12].mxu1  ;;  %v752_v32 = vmul.f32 %v1544_v47, %v681_v18  ;;  %v1614_v33 = vsel %vm286_vm0, %v751_v21, 0.0  ;;  %v784_v34 = vmul.f32 %v1544_v47, %v713_v19  ;;  %v1618_v35 = vsel %vm286_vm0, %v783_v23, 0.0 }
  0xfe   :  { %v465_v10 = vpop.f32.mrb[13].mxu0  ;;  %v593_v11 = vpop.f32.mrb[13].mxu1  ;;  %v840_v37 = vsel %vm286_vm0, %v754_v24, 0.0  ;;  %v1622_v38 = vadd.f32 %v1268_v4, %v1535_v36  ;;  %v1625_v39 = vsel %vm286_vm0, %v786_v25, 0.0  ;;  %v1628_v40 = vadd.f32 %v1300_v5, %v1535_v36 }
  0xff   :  { %v1269_v16 = vpop.f32.mrb[14].mxu0  ;;  %v1301_v17 = vpop.f32.mrb[14].mxu1  ;;  %v1631_v43 = vadd.f32 %v1535_v36, %v465_v10  ;;  %v1634_v44 = vadd.f32 %v1535_v36, %v593_v11  ;;  %v834_v10 = vsel %vm286_vm0, %v752_v32, 0.0  ;;  %v1664_v11 = vsel %vm286_vm0, %v784_v34, 0.0 }
 0x100   :  { %v1596_v20 = vpop.f32.mrb[15].mxu0  ;;  %v1599_v22 = vpop.f32.mrb[15].mxu1  ;;  %v1639_v50 = vadd.f32 %v1269_v16, %v1535_v36  ;;  %v1642_v51 = vadd.f32 %v1301_v17, %v1535_v36  ;;  %v686_v14 = vmax.f32 %v1622_v38, 0.0  ;;  %v718_v15 = vmax.f32 %v1628_v40, 0.0 }
 0x101   :  { %925 = vadd.xlane.f32.xlu1 %v924_v12  ;;  %922 = vadd.xlane.f32.xlu0 %v921_v6  ;;  %v684_v21 = vmax.f32 %v1631_v43, 0.0  ;;  %v1683_v23 = vadd.f32 %v1535_v36, %v1596_v20 }
 0x105   :  { %823 = vadd.xlane.f32.xlu1 %v822_v28  ;;  %820 = vadd.xlane.f32.xlu0 %v819_v26  ;;  %v1272_v41 = vpop.f32.mrb[16].mxu0  ;;  %v1304_v42 = vpop.f32.mrb[16].mxu1  ;;  %v687_v28 = vmax.f32 %v1639_v50, 0.0 }
 0x106   :  { %v490_v45 = vadd.f32 %v1272_v41, %v1535_v36  ;;  %v481_v46 = vpop.f32.mrb[17].mxu0  ;;  %v618_v48 = vadd.f32 %v1304_v42, %v1535_v36  ;;  %v609_v49 = vpop.f32.mrb[17].mxu1 }
 0x107   :  { %v482_v52 = vadd.f32 %v1535_v36, %v481_v46  ;;  %v1273_v53 = vpop.f32.mrb[18].mxu0  ;;  %v610_v54 = vadd.f32 %v1535_v36, %v609_v49  ;;  %v1305_v55 = vpop.f32.mrb[18].mxu1 }
 0x108   :  { %v690_v56 = vmax.f32 %v490_v45, 0.0  ;;  %v493_v57 = vadd.f32 %v1273_v53, %v1535_v36  ;;  %v484_v58 = vpop.f32.mrb[19].mxu0  ;;  %v722_v59 = vmax.f32 %v618_v48, 0.0  ;;  %v621_v60 = vadd.f32 %v1305_v55, %v1535_v36  ;;  %v612_v61 = vpop.f32.mrb[19].mxu1 }
 0x109   :  { %919 = vadd.xlane.f32.xlu1 %v918_v29  ;;  %916 = vadd.xlane.f32.xlu0 %v915_v27  ;;  %v688_v62 = vmax.f32 %v482_v52, 0.0  ;;  %v485_v63 = vadd.f32 %v1535_v36, %v484_v58  ;;  %v720_v0 = vmax.f32 %v610_v54, 0.0  ;;  %v613_v1 = vadd.f32 %v1535_v36, %v612_v61 }
 0x10a   :  { %v691_v2 = vmax.f32 %v493_v57, 0.0  ;;  %v723_v3 = vmax.f32 %v621_v60, 0.0  ;;  %v1651_v4 = vmul.f32 %v1544_v47, %v690_v56  ;;  %v1654_v5 = vmul.f32 %v1544_v47, %v722_v59 }
 0x10b   :  { %v689_v6 = vmax.f32 %v485_v63, 0.0  ;;  %v721_v7 = vmax.f32 %v613_v1, 0.0  ;;  %v1657_v8 = vmul.f32 %v1544_v47, %v688_v62  ;;  %v1660_v9 = vmul.f32 %v1544_v47, %v720_v0 }
 0x10c   :  { %v1667_v12 = vmul.f32 %v1544_v47, %v691_v2  ;;  %v1670_v13 = vmul.f32 %v1544_v47, %v723_v3  ;;  %v719_v29 = vmax.f32 %v1642_v51, 0.0  ;;  %v1711_v56 = vadd.f32 %v1535_v36, %v1599_v22 }
 0x10d   :  { %841 = vadd.xlane.f32.xlu1 %v840_v37  ;;  %838 = vadd.xlane.f32.xlu0 %v837_v30  ;;  %v1276_v16 = vpop.f32.mrb[20].mxu0  ;;  %v1308_v17 = vpop.f32.mrb[20].mxu1  ;;  %v1675_v18 = vmul.f32 %v1544_v47, %v689_v6  ;;  %v1678_v19 = vmul.f32 %v1544_v47, %v721_v7  ;;  %v757_v57 = vmul.f32 %v1544_v47, %v686_v14  ;;  %v716_v60 = vmax.f32 %v1634_v44, 0.0 }
 0x10e   :  { %v506_v24 = vadd.f32 %v1276_v16, %v1535_v36  ;;  %v497_v25 = vpop.f32.mrb[21].mxu0  ;;  %v634_v26 = vadd.f32 %v1308_v17, %v1535_v36  ;;  %v625_v27 = vpop.f32.mrb[21].mxu1  ;;  %v789_v61 = vmul.f32 %v1544_v47, %v718_v15  ;;  %v685_v1 = vmax.f32 %v1683_v23, 0.0 }
 0x10f   :  { %v498_v30 = vadd.f32 %v1535_v36, %v497_v25  ;;  %v1277_v32 = vpop.f32.mrb[22].mxu0  ;;  %v626_v34 = vadd.f32 %v1535_v36, %v625_v27  ;;  %v1309_v37 = vpop.f32.mrb[22].mxu1  ;;  %v755_v2 = vmul.f32 %v1544_v47, %v684_v21  ;;  %v758_v7 = vmul.f32 %v1544_v47, %v687_v28 }
 0x110   :  { %v694_v38 = vmax.f32 %v506_v24, 0.0  ;;  %v509_v20 = vadd.f32 %v1277_v32, %v1535_v36  ;;  %v500_v40 = vpop.f32.mrb[23].mxu0  ;;  %v726_v41 = vmax.f32 %v634_v26, 0.0  ;;  %v637_v42 = vadd.f32 %v1309_v37, %v1535_v36  ;;  %v628_v43 = vpop.f32.mrb[23].mxu1 }
 0x111   :  { %937 = vadd.xlane.f32.xlu1 %v1625_v39  ;;  %934 = vadd.xlane.f32.xlu0 %v1610_v31  ;;  %v692_v45 = vmax.f32 %v498_v30, 0.0  ;;  %v501_v46 = vadd.f32 %v1535_v36, %v500_v40  ;;  %v724_v48 = vmax.f32 %v626_v34, 0.0  ;;  %v629_v49 = vadd.f32 %v1535_v36, %v628_v43 }
 0x112   :  { %v695_v50 = vmax.f32 %v509_v20, 0.0  ;;  %v727_v51 = vmax.f32 %v637_v42, 0.0  ;;  %v1698_v52 = vmul.f32 %v1544_v47, %v694_v38  ;;  %v1701_v53 = vmul.f32 %v1544_v47, %v726_v41 }
 0x113   :  { %v693_v54 = vmax.f32 %v501_v46, 0.0  ;;  %v725_v55 = vmax.f32 %v629_v49, 0.0  ;;  %v1704_v39 = vmul.f32 %v1544_v47, %v692_v45  ;;  %v1707_v31 = vmul.f32 %v1544_v47, %v724_v48 }
 0x114   :  { %v1715_v58 = vmul.f32 %v1544_v47, %v695_v50  ;;  %v1718_v59 = vmul.f32 %v1544_v47, %v727_v51  ;;  %v852_v42 = vsel %vm286_vm0, %v758_v7, 0.0  ;;  %v849_v43 = vsel %vm286_vm0, %v757_v57, 0.0 }
 0x115   :  { %835 = vadd.xlane.f32.xlu1 %v834_v10  ;;  %832 = vadd.xlane.f32.xlu0 %v1614_v33  ;;  %v1280_v62 = vpop.f32.mrb[24].mxu0  ;;  %v1312_v63 = vpop.f32.mrb[24].mxu1  ;;  %v1724_v22 = vmul.f32 %v1544_v47, %v693_v54  ;;  %v1727_v0 = vmul.f32 %v1544_v47, %v725_v55  ;;  %v790_v10 = vmul.f32 %v1544_v47, %v719_v29  ;;  %v717_v48 = vmax.f32 %v1711_v56, 0.0 }
 0x116   :  { %v522_v3 = vadd.f32 %v1280_v62, %v1535_v36  ;;  %v513_v44 = vpop.f32.mrb[25].mxu0  ;;  %v650_v6 = vadd.f32 %v1312_v63, %v1535_v36  ;;  %v641_v33 = vpop.f32.mrb[25].mxu1  ;;  %v787_v49 = vmul.f32 %v1544_v47, %v716_v60  ;;  %v945_v57 = vsel %vm286_vm0, %v789_v61, 0.0 }
 0x117   :  { %v514_v14 = vadd.f32 %v1535_v36, %v513_v44  ;;  %v1281_v15 = vpop.f32.mrb[26].mxu0  ;;  %v642_v16 = vadd.f32 %v1535_v36, %v641_v33  ;;  %v1313_v17 = vpop.f32.mrb[26].mxu1  ;;  %v756_v62 = vmul.f32 %v1544_v47, %v685_v1  ;;  %v948_v60 = vsel %vm286_vm0, %v790_v10, 0.0 }
 0x118   :  { %v698_v24 = vmax.f32 %v522_v3, 0.0  ;;  %v525_v23 = vadd.f32 %v1281_v15, %v1535_v36  ;;  %v516_v21 = vpop.f32.mrb[27].mxu0  ;;  %v730_v25 = vmax.f32 %v650_v6, 0.0  ;;  %v653_v26 = vadd.f32 %v1313_v17, %v1535_v36  ;;  %v644_v27 = vpop.f32.mrb[27].mxu1 }
 0x119   :  { %931 = vadd.xlane.f32.xlu1 %v1664_v11  ;;  %928 = vadd.xlane.f32.xlu0 %v1618_v35  ;;  %v696_v28 = vmax.f32 %v514_v14, 0.0  ;;  %v517_v29 = vadd.f32 %v1535_v36, %v516_v21  ;;  %v728_v30 = vmax.f32 %v642_v16, 0.0  ;;  %v645_v32 = vadd.f32 %v1535_v36, %v644_v27 }
 0x11a   :  { %v699_v34 = vmax.f32 %v525_v23, 0.0  ;;  %v731_v37 = vmax.f32 %v653_v26, 0.0  ;;  %v1744_v38 = vmul.f32 %v1544_v47, %v698_v24  ;;  %v1747_v20 = vmul.f32 %v1544_v47, %v730_v25 }
 0x11b   :  { %v697_v40 = vmax.f32 %v517_v29, 0.0  ;;  %v729_v41 = vmax.f32 %v645_v32, 0.0  ;;  %v1750_v11 = vmul.f32 %v1544_v47, %v696_v28  ;;  %v1753_v35 = vmul.f32 %v1544_v47, %v728_v30 }
 0x11c   :  { %v1758_v45 = vmul.f32 %v1544_v47, %v699_v34  ;;  %v1761_v46 = vmul.f32 %v1544_v47, %v731_v37  ;;  %v843_v6 = vsel %vm286_vm0, %v755_v2, 0.0 }
 0x11d   :  { %853 = vadd.xlane.f32.xlu1 %v852_v42  ;;  %850 = vadd.xlane.f32.xlu0 %v849_v43  ;;  %v1284_v50 = vpop.f32.mrb[28].mxu0  ;;  %v1766_v51 = vmul.f32 %v1544_v47, %v697_v40  ;;  %v1316_v54 = vpop.f32.mrb[28].mxu1  ;;  %v1769_v55 = vmul.f32 %v1544_v47, %v729_v41  ;;  %v846_v40 = vsel %vm286_vm0, %v756_v62, 0.0  ;;  %v864_v62 = vsel %vm286_vm0, %v1667_v12, 0.0 }
 0x11e   :  { %v538_v63 = vadd.f32 %v1284_v50, %v1535_v36  ;;  %v529_v3 = vpop.f32.mrb[29].mxu0  ;;  %v666_v56 = vadd.f32 %v1316_v54, %v1535_v36  ;;  %v657_v44 = vpop.f32.mrb[29].mxu1  ;;  %v10_v54 = vstv %s2198_s4  ;;  %v951_v12 = vsel %vm286_vm0, %v1660_v9, 0.0 }
 0x11f   :  { %v530_v33 = vadd.f32 %v1535_v36, %v529_v3  ;;  %v1285_v7 = vpop.f32.mrb[30].mxu0  ;;  %v658_v14 = vadd.f32 %v1535_v36, %v657_v44  ;;  %v1317_v15 = vpop.f32.mrb[30].mxu1  ;;  %11 = vst [vmem:[#allocation2] sm:$0x1] %v10_v54  ;;  %v957_v3 = vsel %vm286_vm0, %v1654_v5, 0.0  ;;  %v876_v5 = vsel %vm286_vm0, %v1715_v58, 0.0 }
 0x120   :  { %v702_v16 = vmax.f32 %v538_v63, 0.0  ;;  %v541_v61 = vadd.f32 %v1285_v7, %v1535_v36  ;;  %v532_v1 = vpop.f32.mrb[31].mxu0  ;;  %v734_v17 = vmax.f32 %v666_v56, 0.0  ;;  %v669_v24 = vadd.f32 %v1317_v15, %v1535_v36  ;;  %v660_v23 = vpop.f32.mrb[31].mxu1 }
 0x121   :  { %949 = vadd.xlane.f32.xlu1 %v948_v60  ;;  %946 = vadd.xlane.f32.xlu0 %v945_v57  ;;  %v700_v21 = vmax.f32 %v530_v33, 0.0  ;;  %v533_v10 = vadd.f32 %v1535_v36, %v532_v1  ;;  %v732_v2 = vmax.f32 %v658_v14, 0.0  ;;  %v661_v25 = vadd.f32 %v1535_v36, %v660_v23 }
 0x122   :  { %v703_v26 = vmax.f32 %v541_v61, 0.0  ;;  %v735_v27 = vmax.f32 %v669_v24, 0.0  ;;  %v1784_v28 = vmul.f32 %v1544_v47, %v702_v16  ;;  %v1787_v29 = vmul.f32 %v1544_v47, %v734_v17 }
 0x123   :  { %v701_v30 = vmax.f32 %v533_v10, 0.0  ;;  %v733_v32 = vmax.f32 %v661_v25, 0.0  ;;  %v1790_v34 = vmul.f32 %v1544_v47, %v700_v21  ;;  %v1793_v37 = vmul.f32 %v1544_v47, %v732_v2 }
 0x124   :  { %v788_v36 = vmul.f32 %v1544_v47, %v717_v48  ;;  %v774_v41 = vmul.f32 %v1544_v47, %v703_v26  ;;  %v1799_v42 = vmul.f32 %v1544_v47, %v735_v27  ;;  %v939_v48 = vsel %vm286_vm0, %v787_v49, 0.0 }
 0x125   :  { %847 = vadd.xlane.f32.xlu1 %v846_v40  ;;  %844 = vadd.xlane.f32.xlu0 %v843_v6  ;;  %v772_v43 = vmul.f32 %v1544_v47, %v701_v30  ;;  %v1803_v50 = vmul.f32 %v1544_v47, %v733_v32  ;;  %v861_v63 = vsel %vm286_vm0, %v1651_v4, 0.0  ;;  %v960_v47 = vsel %vm286_vm0, %v1670_v13, 0.0 }
 0x126   :  { %v942_v57 = vsel %vm286_vm0, %v788_v36, 0.0  ;;  %v858_v49 = vsel %vm286_vm0, %v1675_v18, 0.0  ;;  %v855_v56 = vsel %vm286_vm0, %v1657_v8, 0.0  ;;  %v954_v4 = vsel %vm286_vm0, %v1678_v19, 0.0  ;;  %v1872_v6 = vld [vmem:[#allocation2] ss:$0 sm:$0xff] }
 0x127   :  { %v873_v13 = vsel %vm286_vm0, %v1698_v52, 0.0  ;;  %v972_v8 = vsel %vm286_vm0, %v1718_v59, 0.0  ;;  %v969_v18 = vsel %vm286_vm0, %v1701_v53, 0.0  ;;  %v870_v9 = vsel %vm286_vm0, %v1724_v22, 0.0 }
 0x128   :  { %v867_v19 = vsel %vm286_vm0, %v1704_v39, 0.0  ;;  %v966_v52 = vsel %vm286_vm0, %v1727_v0, 0.0  ;;  %v963_v58 = vsel %vm286_vm0, %v1707_v31, 0.0  ;;  %v888_v53 = vsel %vm286_vm0, %v1758_v45, 0.0 }
 0x129   :  { %943 = vadd.xlane.f32.xlu1 %v942_v57  ;;  %940 = vadd.xlane.f32.xlu0 %v939_v48  ;;  %v885_v59 = vsel %vm286_vm0, %v1744_v38, 0.0  ;;  %v984_v39 = vsel %vm286_vm0, %v1761_v46, 0.0  ;;  %v981_v22 = vsel %vm286_vm0, %v1747_v20, 0.0  ;;  %v882_v31 = vsel %vm286_vm0, %v1766_v51, 0.0 }
 0x12a   :  { %v879_v0 = vsel %vm286_vm0, %v1750_v11, 0.0  ;;  %v978_v38 = vsel %vm286_vm0, %v1769_v55, 0.0  ;;  %v975_v45 = vsel %vm286_vm0, %v1753_v35, 0.0  ;;  %v900_v20 = vsel %vm286_vm0, %v774_v41, 0.0 }
 0x12b   :  { %v897_v46 = vsel %vm286_vm0, %v1784_v28, 0.0  ;;  %v894_v51 = vsel %vm286_vm0, %v772_v43, 0.0  ;;  %v891_v11 = vsel %vm286_vm0, %v1790_v34, 0.0  ;;  %v990_v55 = vsel %vm286_vm0, %v1803_v50, 0.0 }
 0x12c   :  { %v987_v35 = vsel %vm286_vm0, %v1793_v37, 0.0  ;;  %v996_v44 = vsel %vm286_vm0, %v1799_v42, 0.0  ;;  %v993_v60 = vsel %vm286_vm0, %v1787_v29, 0.0 }
 0x12d   :  { %865 = vadd.xlane.f32.xlu1 %v864_v62  ;;  %862 = vadd.xlane.f32.xlu0 %v861_v63 }
 0x131   :  { %961 = vadd.xlane.f32.xlu1 %v960_v47  ;;  %958 = vadd.xlane.f32.xlu0 %v957_v3 }
 0x135   :  { %859 = vadd.xlane.f32.xlu1 %v858_v49  ;;  %856 = vadd.xlane.f32.xlu0 %v855_v56 }
 0x139   :  { %955 = vadd.xlane.f32.xlu1 %v954_v4  ;;  %952 = vadd.xlane.f32.xlu0 %v951_v12 }
 0x13d   :  { %877 = vadd.xlane.f32.xlu1 %v876_v5  ;;  %874 = vadd.xlane.f32.xlu0 %v873_v13 }
 0x141   :  { %973 = vadd.xlane.f32.xlu1 %v972_v8  ;;  %970 = vadd.xlane.f32.xlu0 %v969_v18 }
 0x145   :  { %871 = vadd.xlane.f32.xlu1 %v870_v9  ;;  %868 = vadd.xlane.f32.xlu0 %v867_v19 }
 0x149   :  { %967 = vadd.xlane.f32.xlu1 %v966_v52  ;;  %964 = vadd.xlane.f32.xlu0 %v963_v58 }
 0x14d   :  { %889 = vadd.xlane.f32.xlu1 %v888_v53  ;;  %886 = vadd.xlane.f32.xlu0 %v885_v59 }
 0x151   :  { %985 = vadd.xlane.f32.xlu1 %v984_v39  ;;  %982 = vadd.xlane.f32.xlu0 %v981_v22 }
 0x155   :  { %883 = vadd.xlane.f32.xlu1 %v882_v31  ;;  %880 = vadd.xlane.f32.xlu0 %v879_v0 }
 0x159   :  { %979 = vadd.xlane.f32.xlu1 %v978_v38  ;;  %976 = vadd.xlane.f32.xlu0 %v975_v45 }
 0x15d   :  { %901 = vadd.xlane.f32.xlu1 %v900_v20  ;;  %898 = vadd.xlane.f32.xlu0 %v897_v46 }
 0x161   :  { %895 = vadd.xlane.f32.xlu1 %v894_v51  ;;  %892 = vadd.xlane.f32.xlu0 %v891_v11 }
 0x165   :  { %991 = vadd.xlane.f32.xlu1 %v990_v55  ;;  %988 = vadd.xlane.f32.xlu0 %v987_v35 }
 0x169   :  { %997 = vadd.xlane.f32.xlu1 %v996_v44  ;;  %994 = vadd.xlane.f32.xlu0 %v993_v60 }
 0x17a   :  { %v911_v33 = vpop.xlane.xlu0 %910  ;;  %v815_v7 = vpop.xlane.xlu1 %814 }
 0x17b   :  { %v1040_v14 = vadd.f32 %v1872_v6, %v911_v33  ;;  %v1008_v15 = vadd.f32 %v1872_v6, %v815_v7 }
 0x17d   :  { %1105 = vst.msk [vmem:[%s2199_s5 + $0x110] sm:$0xff] %vm1070_vm1, %v1040_v14  ;;  %1073 = vst.msk [vmem:[%s2199_s5 + $0x10] sm:$0xff] %vm1070_vm1, %v1008_v15 }
 0x17e   :  { %v818_v16 = vpop.xlane.xlu1 %817  ;;  %v809_v61 = vpop.xlane.xlu0 %808 }
 0x17f   :  { %v1009_v1 = vadd.f32 %v1872_v6, %v818_v16  ;;  %v1006_v17 = vadd.f32 %v1872_v6, %v809_v61 }
 0x181   :  { %1074 = vst.msk [vmem:[%s2199_s5 + $0x18] sm:$0xff] %vm1070_vm1, %v1009_v1  ;;  %1071 = vst.msk [vmem:[%s2199_s5] sm:$0xff] %vm1070_vm1, %v1006_v17 }
 0x182   :  { %v914_v24 = vpop.xlane.xlu1 %913  ;;  %v905_v23 = vpop.xlane.xlu0 %904 }
 0x183   :  { %v1041_v21 = vadd.f32 %v1872_v6, %v914_v24  ;;  %v1038_v10 = vadd.f32 %v1872_v6, %v905_v23 }
 0x185   :  { %1106 = vst.msk [vmem:[%s2199_s5 + $0x118] sm:$0xff] %vm1070_vm1, %v1041_v21  ;;  %1103 = vst.msk [vmem:[%s2199_s5 + $0x100] sm:$0xff] %vm1070_vm1, %v1038_v10 }
 0x186   :  { %v908_v2 = vpop.xlane.xlu1 %907  ;;  %v812_v25 = vpop.xlane.xlu0 %811 }
 0x187   :  { %v1039_v26 = vadd.f32 %v1872_v6, %v908_v2  ;;  %v1007_v27 = vadd.f32 %v1872_v6, %v812_v25 }
 0x189   :  { %1104 = vst.msk [vmem:[%s2199_s5 + $0x108] sm:$0xff] %vm1070_vm1, %v1039_v26  ;;  %1072 = vst.msk [vmem:[%s2199_s5 + $0x8] sm:$0xff] %vm1070_vm1, %v1007_v27 }
 0x18a   :  { %v830_v28 = vpop.xlane.xlu1 %829  ;;  %v827_v29 = vpop.xlane.xlu0 %826 }
 0x18b   :  { %v1013_v30 = vadd.f32 %v1872_v6, %v830_v28  ;;  %v1012_v32 = vadd.f32 %v1872_v6, %v827_v29 }
 0x18d   :  { %1078 = vst.msk [vmem:[%s2199_s5 + $0x38] sm:$0xff] %vm1070_vm1, %v1013_v30  ;;  %1077 = vst.msk [vmem:[%s2199_s5 + $0x30] sm:$0xff] %vm1070_vm1, %v1012_v32 }
 0x18e   :  { %v926_v34 = vpop.xlane.xlu1 %925  ;;  %v923_v37 = vpop.xlane.xlu0 %922 }
 0x18f   :  { %v1045_v40 = vadd.f32 %v1872_v6, %v926_v34  ;;  %v1044_v36 = vadd.f32 %v1872_v6, %v923_v37 }
 0x191   :  { %1110 = vst.msk [vmem:[%s2199_s5 + $0x138] sm:$0xff] %vm1070_vm1, %v1045_v40  ;;  %1109 = vst.msk [vmem:[%s2199_s5 + $0x130] sm:$0xff] %vm1070_vm1, %v1044_v36 }
 0x192   :  { %v824_v41 = vpop.xlane.xlu1 %823  ;;  %v821_v42 = vpop.xlane.xlu0 %820 }
 0x193   :  { %v1011_v43 = vadd.f32 %v1872_v6, %v824_v41  ;;  %v1010_v50 = vadd.f32 %v1872_v6, %v821_v42 }
 0x195   :  { %1076 = vst.msk [vmem:[%s2199_s5 + $0x28] sm:$0xff] %vm1070_vm1, %v1011_v43  ;;  %1075 = vst.msk [vmem:[%s2199_s5 + $0x20] sm:$0xff] %vm1070_vm1, %v1010_v50 }
 0x196   :  { %v920_v54 = vpop.xlane.xlu1 %919  ;;  %v917_v57 = vpop.xlane.xlu0 %916 }
 0x197   :  { %v1043_v48 = vadd.f32 %v1872_v6, %v920_v54  ;;  %v1042_v62 = vadd.f32 %v1872_v6, %v917_v57 }
 0x199   :  { %1108 = vst.msk [vmem:[%s2199_s5 + $0x128] sm:$0xff] %vm1070_vm1, %v1043_v48  ;;  %1107 = vst.msk [vmem:[%s2199_s5 + $0x120] sm:$0xff] %vm1070_vm1, %v1042_v62 }
 0x19a   :  { %v842_v63 = vpop.xlane.xlu1 %841  ;;  %v839_v47 = vpop.xlane.xlu0 %838 }
 0x19b   :  { %v1017_v3 = vadd.f32 %v1872_v6, %v842_v63  ;;  %v1016_v49 = vadd.f32 %v1872_v6, %v839_v47 }
 0x19d   :  { %1082 = vst.msk [vmem:[%s2199_s5 + $0x58] sm:$0xff] %vm1070_vm1, %v1017_v3  ;;  %1081 = vst.msk [vmem:[%s2199_s5 + $0x50] sm:$0xff] %vm1070_vm1, %v1016_v49 }
 0x19e   :  { %v938_v56 = vpop.xlane.xlu1 %937  ;;  %v935_v4 = vpop.xlane.xlu0 %934 }
 0x19f   :  { %v1049_v12 = vadd.f32 %v1872_v6, %v938_v56  ;;  %v1048_v5 = vadd.f32 %v1872_v6, %v935_v4 }
 0x1a1   :  { %1114 = vst.msk [vmem:[%s2199_s5 + $0x158] sm:$0xff] %vm1070_vm1, %v1049_v12  ;;  %1113 = vst.msk [vmem:[%s2199_s5 + $0x150] sm:$0xff] %vm1070_vm1, %v1048_v5 }
 0x1a2   :  { %v836_v13 = vpop.xlane.xlu1 %835  ;;  %v833_v8 = vpop.xlane.xlu0 %832 }
 0x1a3   :  { %v1015_v18 = vadd.f32 %v1872_v6, %v836_v13  ;;  %v1014_v9 = vadd.f32 %v1872_v6, %v833_v8 }
 0x1a5   :  { %1080 = vst.msk [vmem:[%s2199_s5 + $0x48] sm:$0xff] %vm1070_vm1, %v1015_v18  ;;  %1079 = vst.msk [vmem:[%s2199_s5 + $0x40] sm:$0xff] %vm1070_vm1, %v1014_v9 }
 0x1a6   :  { %v932_v19 = vpop.xlane.xlu1 %931  ;;  %v929_v52 = vpop.xlane.xlu0 %928 }
 0x1a7   :  { %v1047_v58 = vadd.f32 %v1872_v6, %v932_v19  ;;  %v1046_v53 = vadd.f32 %v1872_v6, %v929_v52 }
 0x1a9   :  { %1112 = vst.msk [vmem:[%s2199_s5 + $0x148] sm:$0xff] %vm1070_vm1, %v1047_v58  ;;  %1111 = vst.msk [vmem:[%s2199_s5 + $0x140] sm:$0xff] %vm1070_vm1, %v1046_v53 }
 0x1aa   :  { %v854_v59 = vpop.xlane.xlu1 %853  ;;  %v851_v39 = vpop.xlane.xlu0 %850 }
 0x1ab   :  { %v1021_v22 = vadd.f32 %v1872_v6, %v854_v59  ;;  %v1020_v31 = vadd.f32 %v1872_v6, %v851_v39 }
 0x1ad   :  { %1086 = vst.msk [vmem:[%s2199_s5 + $0x78] sm:$0xff] %vm1070_vm1, %v1021_v22  ;;  %1085 = vst.msk [vmem:[%s2199_s5 + $0x70] sm:$0xff] %vm1070_vm1, %v1020_v31 }
 0x1ae   :  { %v950_v0 = vpop.xlane.xlu1 %949  ;;  %v947_v38 = vpop.xlane.xlu0 %946 }
 0x1af   :  { %v1053_v45 = vadd.f32 %v1872_v6, %v950_v0  ;;  %v1052_v20 = vadd.f32 %v1872_v6, %v947_v38 }
 0x1b1   :  { %1118 = vst.msk [vmem:[%s2199_s5 + $0x178] sm:$0xff] %vm1070_vm1, %v1053_v45  ;;  %1117 = vst.msk [vmem:[%s2199_s5 + $0x170] sm:$0xff] %vm1070_vm1, %v1052_v20 }
 0x1b2   :  { %v848_v46 = vpop.xlane.xlu1 %847  ;;  %v845_v51 = vpop.xlane.xlu0 %844 }
 0x1b3   :  { %v1019_v11 = vadd.f32 %v1872_v6, %v848_v46  ;;  %v1018_v55 = vadd.f32 %v1872_v6, %v845_v51 }
 0x1b5   :  { %1084 = vst.msk [vmem:[%s2199_s5 + $0x68] sm:$0xff] %vm1070_vm1, %v1019_v11  ;;  %1083 = vst.msk [vmem:[%s2199_s5 + $0x60] sm:$0xff] %vm1070_vm1, %v1018_v55 }
 0x1b6   :  { %v944_v35 = vpop.xlane.xlu1 %943  ;;  %v941_v44 = vpop.xlane.xlu0 %940 }
 0x1b7   :  { %v1051_v60 = vadd.f32 %v1872_v6, %v944_v35  ;;  %v1050_v33 = vadd.f32 %v1872_v6, %v941_v44 }
 0x1b9   :  { %1116 = vst.msk [vmem:[%s2199_s5 + $0x168] sm:$0xff] %vm1070_vm1, %v1051_v60  ;;  %1115 = vst.msk [vmem:[%s2199_s5 + $0x160] sm:$0xff] %vm1070_vm1, %v1050_v33 }
 0x1ba   :  { %v866_v7 = vpop.xlane.xlu1 %865  ;;  %v863_v14 = vpop.xlane.xlu0 %862 }
 0x1bb   :  { %v1025_v15 = vadd.f32 %v1872_v6, %v866_v7  ;;  %v1024_v16 = vadd.f32 %v1872_v6, %v863_v14 }
 0x1bd   :  { %1090 = vst.msk [vmem:[%s2199_s5 + $0x98] sm:$0xff] %vm1070_vm1, %v1025_v15  ;;  %1089 = vst.msk [vmem:[%s2199_s5 + $0x90] sm:$0xff] %vm1070_vm1, %v1024_v16 }
 0x1be   :  { %v962_v61 = vpop.xlane.xlu1 %961  ;;  %v959_v1 = vpop.xlane.xlu0 %958 }
 0x1bf   :  { %v1057_v17 = vadd.f32 %v1872_v6, %v962_v61  ;;  %v1056_v24 = vadd.f32 %v1872_v6, %v959_v1 }
 0x1c1   :  { %1122 = vst.msk [vmem:[%s2199_s5 + $0x198] sm:$0xff] %vm1070_vm1, %v1057_v17  ;;  %1121 = vst.msk [vmem:[%s2199_s5 + $0x190] sm:$0xff] %vm1070_vm1, %v1056_v24 }
 0x1c2   :  { %v860_v23 = vpop.xlane.xlu1 %859  ;;  %v857_v21 = vpop.xlane.xlu0 %856 }
 0x1c3   :  { %v1023_v10 = vadd.f32 %v1872_v6, %v860_v23  ;;  %v1022_v2 = vadd.f32 %v1872_v6, %v857_v21 }
 0x1c5   :  { %1088 = vst.msk [vmem:[%s2199_s5 + $0x88] sm:$0xff] %vm1070_vm1, %v1023_v10  ;;  %1087 = vst.msk [vmem:[%s2199_s5 + $0x80] sm:$0xff] %vm1070_vm1, %v1022_v2 }
 0x1c6   :  { %v956_v25 = vpop.xlane.xlu1 %955  ;;  %v953_v26 = vpop.xlane.xlu0 %952 }
 0x1c7   :  { %v1055_v27 = vadd.f32 %v1872_v6, %v956_v25  ;;  %v1054_v28 = vadd.f32 %v1872_v6, %v953_v26 }
 0x1c9   :  { %1120 = vst.msk [vmem:[%s2199_s5 + $0x188] sm:$0xff] %vm1070_vm1, %v1055_v27  ;;  %1119 = vst.msk [vmem:[%s2199_s5 + $0x180] sm:$0xff] %vm1070_vm1, %v1054_v28 }
 0x1ca   :  { %v878_v29 = vpop.xlane.xlu1 %877  ;;  %v875_v30 = vpop.xlane.xlu0 %874 }
 0x1cb   :  { %v1029_v32 = vadd.f32 %v1872_v6, %v878_v29  ;;  %v1028_v34 = vadd.f32 %v1872_v6, %v875_v30 }
 0x1cd   :  { %1094 = vst.msk [vmem:[%s2199_s5 + $0xb8] sm:$0xff] %vm1070_vm1, %v1029_v32  ;;  %1093 = vst.msk [vmem:[%s2199_s5 + $0xb0] sm:$0xff] %vm1070_vm1, %v1028_v34 }
 0x1ce   :  { %v974_v37 = vpop.xlane.xlu1 %973  ;;  %v971_v40 = vpop.xlane.xlu0 %970 }
 0x1cf   :  { %v1061_v36 = vadd.f32 %v1872_v6, %v974_v37  ;;  %v1060_v41 = vadd.f32 %v1872_v6, %v971_v40 }
 0x1d1   :  { %1126 = vst.msk [vmem:[%s2199_s5 + $0x1b8] sm:$0xff] %vm1070_vm1, %v1061_v36  ;;  %1125 = vst.msk [vmem:[%s2199_s5 + $0x1b0] sm:$0xff] %vm1070_vm1, %v1060_v41 }
 0x1d2   :  { %v872_v42 = vpop.xlane.xlu1 %871  ;;  %v869_v43 = vpop.xlane.xlu0 %868 }
 0x1d3   :  { %v1027_v50 = vadd.f32 %v1872_v6, %v872_v42  ;;  %v1026_v54 = vadd.f32 %v1872_v6, %v869_v43 }
 0x1d5   :  { %1092 = vst.msk [vmem:[%s2199_s5 + $0xa8] sm:$0xff] %vm1070_vm1, %v1027_v50  ;;  %1091 = vst.msk [vmem:[%s2199_s5 + $0xa0] sm:$0xff] %vm1070_vm1, %v1026_v54 }
 0x1d6   :  { %v968_v57 = vpop.xlane.xlu1 %967  ;;  %v965_v48 = vpop.xlane.xlu0 %964 }
 0x1d7   :  { %v1059_v62 = vadd.f32 %v1872_v6, %v968_v57  ;;  %v1058_v63 = vadd.f32 %v1872_v6, %v965_v48 }
 0x1d9   :  { %1124 = vst.msk [vmem:[%s2199_s5 + $0x1a8] sm:$0xff] %vm1070_vm1, %v1059_v62  ;;  %1123 = vst.msk [vmem:[%s2199_s5 + $0x1a0] sm:$0xff] %vm1070_vm1, %v1058_v63 }
 0x1da   :  { %v890_v47 = vpop.xlane.xlu1 %889  ;;  %v887_v3 = vpop.xlane.xlu0 %886 }
 0x1db   :  { %v1033_v49 = vadd.f32 %v1872_v6, %v890_v47  ;;  %v1032_v56 = vadd.f32 %v1872_v6, %v887_v3 }
 0x1dd   :  { %1098 = vst.msk [vmem:[%s2199_s5 + $0xd8] sm:$0xff] %vm1070_vm1, %v1033_v49  ;;  %1097 = vst.msk [vmem:[%s2199_s5 + $0xd0] sm:$0xff] %vm1070_vm1, %v1032_v56 }
 0x1de   :  { %v986_v4 = vpop.xlane.xlu1 %985  ;;  %v983_v12 = vpop.xlane.xlu0 %982 }
 0x1df   :  { %v1065_v5 = vadd.f32 %v1872_v6, %v986_v4  ;;  %v1064_v13 = vadd.f32 %v1872_v6, %v983_v12 }
 0x1e1   :  { %1130 = vst.msk [vmem:[%s2199_s5 + $0x1d8] sm:$0xff] %vm1070_vm1, %v1065_v5  ;;  %1129 = vst.msk [vmem:[%s2199_s5 + $0x1d0] sm:$0xff] %vm1070_vm1, %v1064_v13 }
 0x1e2   :  { %v884_v8 = vpop.xlane.xlu1 %883  ;;  %v881_v18 = vpop.xlane.xlu0 %880 }
 0x1e3   :  { %v1031_v9 = vadd.f32 %v1872_v6, %v884_v8  ;;  %v1030_v19 = vadd.f32 %v1872_v6, %v881_v18 }
 0x1e5   :  { %1096 = vst.msk [vmem:[%s2199_s5 + $0xc8] sm:$0xff] %vm1070_vm1, %v1031_v9  ;;  %1095 = vst.msk [vmem:[%s2199_s5 + $0xc0] sm:$0xff] %vm1070_vm1, %v1030_v19 }
 0x1e6   :  { %v980_v52 = vpop.xlane.xlu1 %979  ;;  %v977_v58 = vpop.xlane.xlu0 %976 }
 0x1e7   :  { %v1063_v53 = vadd.f32 %v1872_v6, %v980_v52  ;;  %v1062_v59 = vadd.f32 %v1872_v6, %v977_v58 }
 0x1e9   :  { %1128 = vst.msk [vmem:[%s2199_s5 + $0x1c8] sm:$0xff] %vm1070_vm1, %v1063_v53  ;;  %1127 = vst.msk [vmem:[%s2199_s5 + $0x1c0] sm:$0xff] %vm1070_vm1, %v1062_v59 }
 0x1ea   :  { %v902_v39 = vpop.xlane.xlu1 %901  ;;  %v899_v22 = vpop.xlane.xlu0 %898 }
 0x1eb   :  { %v1037_v31 = vadd.f32 %v1872_v6, %v902_v39  ;;  %v1036_v0 = vadd.f32 %v1872_v6, %v899_v22 }
 0x1ed   :  { %1102 = vst.msk [vmem:[%s2199_s5 + $0xf8] sm:$0xff] %vm1070_vm1, %v1037_v31  ;;  %1101 = vst.msk [vmem:[%s2199_s5 + $0xf0] sm:$0xff] %vm1070_vm1, %v1036_v0 }
 0x1ee   :  { %v896_v38 = vpop.xlane.xlu1 %895  ;;  %v893_v45 = vpop.xlane.xlu0 %892 }
 0x1ef   :  { %v1035_v20 = vadd.f32 %v1872_v6, %v896_v38  ;;  %v1034_v46 = vadd.f32 %v1872_v6, %v893_v45 }
 0x1f1   :  { %1100 = vst.msk [vmem:[%s2199_s5 + $0xe8] sm:$0xff] %vm1070_vm1, %v1035_v20  ;;  %1099 = vst.msk [vmem:[%s2199_s5 + $0xe0] sm:$0xff] %vm1070_vm1, %v1034_v46 }
 0x1f2   :  { %v992_v51 = vpop.xlane.xlu1 %991  ;;  %v989_v11 = vpop.xlane.xlu0 %988 }
 0x1f3   :  { %v1067_v55 = vadd.f32 %v1872_v6, %v992_v51  ;;  %v1066_v35 = vadd.f32 %v1872_v6, %v989_v11 }
 0x1f5   :  { %1132 = vst.msk [vmem:[%s2199_s5 + $0x1e8] sm:$0xff] %vm1070_vm1, %v1067_v55  ;;  %1131 = vst.msk [vmem:[%s2199_s5 + $0x1e0] sm:$0xff] %vm1070_vm1, %v1066_v35 }
 0x1f6   :  { %v998_v44 = vpop.xlane.xlu1 %997  ;;  %v995_v60 = vpop.xlane.xlu0 %994 }
 0x1f7   :  { %v1069_v33 = vadd.f32 %v1872_v6, %v998_v44  ;;  %v1068_v7 = vadd.f32 %v1872_v6, %v995_v60 }
 0x1f9   :  { %1134 = vst.msk [vmem:[%s2199_s5 + $0x1f8] sm:$0xff] %vm1070_vm1, %v1069_v33  ;;  %1133 = vst.msk [vmem:[%s2199_s5 + $0x1f0] sm:$0xff] %vm1070_vm1, %v1068_v7 }

</bundles_post_ra>
